<compile_context>
chip_gen: v5e
topology: v5e:2x2
jax: 0.10.0
libtpu: 0.0.40
codegen_flags: <defaults>
</compile_context>

<pallas_src>
import functools

import jax
import jax.numpy as jnp
from jax.experimental import pallas as pl
from jax.experimental.pallas import tpu as pltpu

_NEG_LARGE = -1e30  # "minus infinity" for padded vocab columns (avoids inf/nan)


def _round_up(x, m):
    return ((x + m - 1) // m) * m


def _device_defaults():
    """(default row tile, logits-cache byte cap, vmem_limit cap) per chip gen."""
    tm, cache_cap, vmem_cap = 256, 24 << 20, 48 << 20  # safe for v7x (64 MiB VMEM)
    try:
        kind = jax.devices()[0].device_kind.lower()
        if any(t in kind for t in ("v5", "v6")) and "7" not in kind:
            # 128 MiB VMEM parts: a bigger row tile cuts weight re-streaming.
            tm, cache_cap, vmem_cap = 512, 40 << 20, 96 << 20
    except Exception:
        pass
    return tm, cache_cap, vmem_cap


def _pick_vocab_tile(V, tv_req):
    """Vocab tile (multiple of 128); prefer a divisor of V so V_pad == V."""
    tv_req = max(128, (tv_req // 128) * 128)
    if V % 128 == 0:
        tv = 128
        c = 128
        while c <= min(V, tv_req):
            if V % c == 0:
                tv = c
            c += 128
        return tv, V
    tv = min(tv_req, _round_up(V, 128))
    return tv, _round_up(V, tv)


def prepare_generator_params(weight, bias, *, tv=512):
    """One-time prep of the generator parameters (hoisted out of the forward).

    weight: [D, V]; bias: [V]  ->  (w_bf16 [D, V_pad], bias_f32 [1, V_pad],
    V, tv).  Padded vocab columns get _NEG_LARGE bias so exp() kills them.
    """
    D, V = weight.shape
    tv, V_pad = _pick_vocab_tile(V, tv)
    w = weight.astype(jnp.bfloat16)
    b = bias.reshape(1, V).astype(jnp.float32)
    if V_pad != V:
        w = jnp.pad(w, ((0, 0), (0, V_pad - V)))
        b = jnp.pad(b, ((0, 0), (0, V_pad - V)), constant_values=_NEG_LARGE)
    return w, b, V, tv


def _generator_kernel(x_ref, w_ref, b_ref, o_ref, m_ref, l_ref, cache_ref, *,
                      nj, tv):
    """One (row-tile, step) of log_softmax(x @ W + b, axis=-1).

    Grid axis 1 has 2*nj steps:
      phase 0 (j <  nj): matmul one vocab tile, stash the logits in the VMEM
                         cache, update running max / sum-of-exp.
      phase 1 (j >= nj): read the cached logits tile and emit logits - lse.
    The matmul (and the weight HBM stream) runs exactly once per tile.
    """
    j = pl.program_id(1)

    @pl.when(j == 0)
    def _():
        m_ref[...] = jnp.full_like(m_ref[...], _NEG_LARGE)
        l_ref[...] = jnp.zeros_like(l_ref[...])

    @pl.when(j < nj)
    def _():
        # bf16 operands on the MXU, f32 accumulation; bias added in f32.
        logits = (
            jnp.dot(x_ref[...], w_ref[...], preferred_element_type=jnp.float32)
            + b_ref[...]
        )
        m_prev = m_ref[...]
        m_new = jnp.maximum(m_prev, jnp.max(logits, axis=-1, keepdims=True))
        l_ref[...] = (
            l_ref[...] * jnp.exp(m_prev - m_new)
            + jnp.sum(jnp.exp(logits - m_new), axis=-1, keepdims=True)
        )
        m_ref[...] = m_new
        start = pl.multiple_of(j * tv, tv)
        cache_ref[:, pl.ds(start, tv)] = logits.astype(cache_ref.dtype)

    @pl.when(j >= nj)
    def _():
        lse = m_ref[...] + jnp.log(l_ref[...])
        start = pl.multiple_of((j - nj) * tv, tv)
        logits = cache_ref[:, pl.ds(start, tv)].astype(jnp.float32)
        # Padded vocab columns come out as ~(-1e30 - lse); with a bf16
        # out_dtype they overflow to -inf, harmless since they are sliced
        # away by the wrapper.
        o_ref[...] = (logits - lse).astype(o_ref.dtype)


def generator_apply(x, w_padded, b_padded, vocab, *, tv, tm=None,
                    out_dtype=jnp.float32):
    """log_softmax(x @ W + b) with pre-prepared (bf16, vocab-padded) params."""
    B, S, D = x.shape
    V_pad = w_padded.shape[1]
    V = vocab
    N = B * S

    tm_default, cache_cap, vmem_cap = _device_defaults()
    if tm is None:
        tm = tm_default

    # Row tile: multiple of 8 (sublanes), shrunk until the (worst-case bf16)
    # logits cache fits the per-generation VMEM budget.
    tm = min(tm, _round_up(N, 8))
    while tm > 8 and tm * V_pad * 2 > cache_cap:
        tm = max(8, (tm // 2 // 8) * 8)
    N_pad = _round_up(N, tm)
    ni = N_pad // tm
    nj = V_pad // tv

    # f32 cache when it fits comfortably (phase-1 logits exact), else bf16.
    cache_dtype = jnp.float32 if tm * V_pad * 4 <= cache_cap // 2 else jnp.bfloat16

    # TODO(synk): on v7x, when ni == 1 (decode-sized N) the single 'parallel'
    # row axis leaves one TensorCore idle; a vocab split with a cross-core
    # combine would recover it.

    x2 = x.reshape(N, D).astype(jnp.bfloat16)
    if N_pad != N:
        x2 = jnp.pad(x2, ((0, N_pad - N), (0, 0)))

    out_isize = jnp.dtype(out_dtype).itemsize
    cache_isize = jnp.dtype(cache_dtype).itemsize
    est = (
        2 * tm * D * 2              # x row tile (bf16, double-buffered)
        + 2 * D * tv * 2            # weight vocab tile (bf16, double-buffered)
        + 2 * tv * 4                # bias tile
        + 2 * tm * tv * out_isize   # output tile (double-buffered)
        + tm * V_pad * cache_isize  # logits cache scratch
        + 2 * tm * 128 * 4          # (tm, 1) f32 m/l scratch, lane-padded
        + 4 * tm * tv * 4           # f32 logits / exp temporaries
    )
    vmem_limit = int(min(vmem_cap, max(est + est // 4, 16 << 20)))

    kernel = functools.partial(_generator_kernel, nj=nj, tv=tv)

    out = pl.pallas_call(
        kernel,
        out_shape=jax.ShapeDtypeStruct((N_pad, V_pad), out_dtype),
        grid_spec=pltpu.PrefetchScalarGridSpec(
            num_scalar_prefetch=0,
            grid=(ni, 2 * nj),
            in_specs=[
                # x row-tile: constant across the vocab/phase axis.
                pl.BlockSpec((tm, D), lambda i, j: (i, 0)),
                # weight / bias vocab tiles: streamed during phase 0 only; the
                # index is pinned during phase 1 so no tile is re-DMA'd.
                pl.BlockSpec((D, tv),
                             lambda i, j: (0, jnp.where(j < nj, j, nj - 1))),
                pl.BlockSpec((1, tv),
                             lambda i, j: (0, jnp.where(j < nj, j, nj - 1))),
            ],
            # Phase 0 keeps the output block pinned at (i, 0): Pallas only
            # writes an output block back when its block index changes, so no
            # garbage write-back happens before phase 1 fills it.  Phase 1
            # writes each lane-dense vocab tile exactly once.
            out_specs=pl.BlockSpec(
                (tm, tv), lambda i, j: (i, jnp.maximum(j - nj, 0))
            ),
            scratch_shapes=[
                pltpu.VMEM((tm, 1), jnp.float32),      # running max
                pltpu.VMEM((tm, 1), jnp.float32),      # running sum of exp
                pltpu.VMEM((tm, V_pad), cache_dtype),  # per-row-tile logits cache
            ],
        ),
        compiler_params=pltpu.CompilerParams(
            dimension_semantics=("parallel", "arbitrary"),
            vmem_limit_bytes=vmem_limit,
        ),
    )(x2, w_padded, b_padded)

    if N_pad != N or V_pad != V:
        out = out[:N, :V]
    return out.reshape(B, S, V)


def generator_forward(x, weight, bias, *, tm=None, tv=512, out_dtype=jnp.float32):
    """Convenience wrapper: log_softmax(x @ weight + bias, axis=-1).

    x: [B, S, D]; weight: [D, V]; bias: [V]  ->  [B, S, V].  For repeated
    calls, run prepare_generator_params once and reuse via generator_apply.
    """
    w, b, V, tv = prepare_generator_params(weight, bias, tv=tv)
    return generator_apply(x, w, b, V, tv=tv, tm=tm, out_dtype=out_dtype)


def _reference(x, weight, bias):
    """Reference with matching bf16 matmul precision (f32 softmax)."""
    B, S, D = x.shape
    logits = (
        jnp.dot(
            x.reshape(-1, D).astype(jnp.bfloat16),
            weight.astype(jnp.bfloat16),
            preferred_element_type=jnp.float32,
        )
        + bias.astype(jnp.float32)
    )
    return jax.nn.log_softmax(logits, axis=-1).reshape(B, S, -1)


if __name__ == "__main__":
    key = jax.random.PRNGKey(0)

    # ---- test 1: small aligned shapes -------------------------------------
    batch, seq, d_model, vocab = 2, 8, 32, 128
    kx, kw, kb, key = jax.random.split(key, 4)
    bound = 1.0 / (d_model ** 0.5)
    weight = jax.random.uniform(kw, (d_model, vocab), jnp.float32,
                                minval=-bound, maxval=bound)
    bias = jax.random.uniform(kb, (vocab,), jnp.float32,
                              minval=-bound, maxval=bound)
    x = jax.random.normal(kx, (batch, seq, d_model), jnp.float32)

    # One-time param prep (hoisted out of the hot path), then the kernel call.
    w_p, b_p, V_real, tv_sel = prepare_generator_params(weight, bias)
    out = jax.block_until_ready(generator_apply(x, w_p, b_p, V_real, tv=tv_sel))
    ref = _reference(x, weight, bias)
    assert out.shape == (batch, seq, vocab)
    assert jnp.allclose(out, ref, atol=1e-4, rtol=1e-4), float(
        jnp.max(jnp.abs(out - ref))
    )

    # ---- test 2: shapes that exercise the row / vocab padding path --------
    b2_, s2_, d2_, v2_ = 2, 5, 32, 200  # N=10 (not x8), V=200 (not x128)
    kx2, kw2, kb2, key = jax.random.split(key, 4)
    bound2 = 1.0 / (d2_ ** 0.5)
    w2 = jax.random.uniform(kw2, (d2_, v2_), jnp.float32,
                            minval=-bound2, maxval=bound2)
    bb2 = jax.random.uniform(kb2, (v2_,), jnp.float32,
                             minval=-bound2, maxval=bound2)
    x2_ = jax.random.normal(kx2, (b2_, s2_, d2_), jnp.float32)

    out2 = jax.block_until_ready(generator_forward(x2_, w2, bb2))
    ref2 = _reference(x2_, w2, bb2)
    assert out2.shape == (b2_, s2_, v2_)
    assert jnp.allclose(out2, ref2, atol=1e-4, rtol=1e-4), float(
        jnp.max(jnp.abs(out2 - ref2))
    )

    # ---- test 3: multi row-tile + multi vocab-tile (cache sweep) ----------
    b3_, s3_, d3_, v3_ = 2, 12, 32, 384  # forced tm=8, tv=128 -> ni=3, nj=3
    kx3, kw3, kb3, key = jax.random.split(key, 4)
    bound3 = 1.0 / (d3_ ** 0.5)
    w3 = jax.random.uniform(kw3, (d3_, v3_), jnp.float32,
                            minval=-bound3, maxval=bound3)
    bb3 = jax.random.uniform(kb3, (v3_,), jnp.float32,
                             minval=-bound3, maxval=bound3)
    x3_ = jax.random.normal(kx3, (b3_, s3_, d3_), jnp.float32)

    out3 = jax.block_until_ready(generator_forward(x3_, w3, bb3, tm=8, tv=128))
    ref3 = _reference(x3_, w3, bb3)
    assert out3.shape == (b3_, s3_, v3_)
    assert jnp.allclose(out3, ref3, atol=1e-4, rtol=1e-4), float(
        jnp.max(jnp.abs(out3 - ref3))
    )

    print("KERNEL_OK")
</pallas_src>

<mosaic_0001>
module attributes {stable_mosaic.version = 11 : i64} {
  func.func @_generator_kernel(%arg0: i32, %arg1: i32, %arg2: memref<16x32xbf16, #tpu.memory_space<vmem>>, %arg3: memref<32x128xbf16, #tpu.memory_space<vmem>>, %arg4: memref<1x128xf32, #tpu.memory_space<vmem>>, %arg5: memref<16x128xf32, #tpu.memory_space<vmem>>, %arg6: memref<16x1xf32, #tpu.memory_space<vmem>>, %arg7: memref<16x1xf32, #tpu.memory_space<vmem>>, %arg8: memref<16x128xf32, #tpu.memory_space<vmem>>) attributes {dimension_semantics = [#tpu.dimension_semantics<parallel>, #tpu.dimension_semantics<arbitrary>], iteration_bounds = array<i64: 1, 2>, scalar_prefetch = 0 : i64, scratch_operands = 3 : i64, tpu.core_type = #tpu.core_type<tc>, window_params = [{transform_indices = @transform_0, window_bounds = array<i64: 16, 32>}, {transform_indices = @transform_1, window_bounds = array<i64: 32, 128>}, {transform_indices = @transform_2, window_bounds = array<i64: 1, 128>}, {transform_indices = @transform_3, window_bounds = array<i64: 16, 128>}]} {
    %c0_i32 = arith.constant 0 : i32
    %0 = arith.cmpi eq, %arg1, %c0_i32 : i32
    %1 = arith.extui %0 : i1 to i32
    %c0_i32_0 = arith.constant 0 : i32
    %2 = arith.cmpi ne, %1, %c0_i32_0 : i32
    scf.if %2 {
      %cst = arith.constant -1.000000e+30 : f32
      %9 = vector.broadcast %cst : f32 to vector<16x1xf32>
      %c0 = arith.constant 0 : index
      %c0_4 = arith.constant 0 : index
      %10 = vector.load %arg6[%c0, %c0_4] : memref<16x1xf32, #tpu.memory_space<vmem>>, vector<16x1xf32>
      tpu.vector_store %arg6[%c0, %c0_4], %9 {strides = array<i32>} : memref<16x1xf32, #tpu.memory_space<vmem>>, vector<16x1xf32>,
      %cst_5 = arith.constant 0.000000e+00 : f32
      %11 = vector.broadcast %cst_5 : f32 to vector<16x1xf32>
      %c0_6 = arith.constant 0 : index
      %c0_7 = arith.constant 0 : index
      %12 = vector.load %arg7[%c0_6, %c0_7] : memref<16x1xf32, #tpu.memory_space<vmem>>, vector<16x1xf32>
      tpu.vector_store %arg7[%c0_6, %c0_7], %11 {strides = array<i32>} : memref<16x1xf32, #tpu.memory_space<vmem>>, vector<16x1xf32>,
    } else {
    }
    %c1_i32 = arith.constant 1 : i32
    %3 = arith.cmpi slt, %arg1, %c1_i32 : i32
    %4 = arith.extui %3 : i1 to i32
    %c0_i32_1 = arith.constant 0 : i32
    %5 = arith.cmpi ne, %4, %c0_i32_1 : i32
    scf.if %5 {
      %c0 = arith.constant 0 : index
      %c0_4 = arith.constant 0 : index
      %9 = vector.load %arg2[%c0, %c0_4] : memref<16x32xbf16, #tpu.memory_space<vmem>>, vector<16x32xbf16>
      %c0_5 = arith.constant 0 : index
      %c0_6 = arith.constant 0 : index
      %10 = vector.load %arg3[%c0_5, %c0_6] : memref<32x128xbf16, #tpu.memory_space<vmem>>, vector<32x128xbf16>
      %cst = arith.constant dense<0.000000e+00> : vector<16x128xf32>
      %11 = tpu.matmul %9, %10, %cst {dimension_numbers = #tpu.dot_dimension_numbers<[1], [0], [0], [1], [0, 0, 1, 1], [], []>} : vector<16x32xbf16>, vector<32x128xbf16>, vector<16x128xf32> -> vector<16x128xf32>
      %c0_7 = arith.constant 0 : index
      %c0_8 = arith.constant 0 : index
      %12 = vector.load %arg4[%c0_7, %c0_8] : memref<1x128xf32, #tpu.memory_space<vmem>>, vector<1x128xf32>
      %13 = vector.broadcast %12 : vector<1x128xf32> to vector<16x128xf32>
      %14 = arith.addf %11, %13 : vector<16x128xf32>
      %c0_9 = arith.constant 0 : index
      %c0_10 = arith.constant 0 : index
      %15 = vector.load %arg6[%c0_9, %c0_10] : memref<16x1xf32, #tpu.memory_space<vmem>>, vector<16x1xf32>
      %cst_11 = arith.constant dense<0xFF800000> : vector<16xf32>
      %16 = vector.multi_reduction <maximumf>, %14, %cst_11 [1] : vector<16x128xf32> to vector<16xf32>
      %17 = vector.shape_cast %16 : vector<16xf32> to vector<16x1xf32>
      %18 = arith.maximumf %15, %17 : vector<16x1xf32>
      %c0_12 = arith.constant 0 : index
      %c0_13 = arith.constant 0 : index
      %19 = vector.load %arg7[%c0_12, %c0_13] : memref<16x1xf32, #tpu.memory_space<vmem>>, vector<16x1xf32>
      %20 = arith.subf %15, %18 : vector<16x1xf32>
      %21 = math.exp %20 : vector<16x1xf32>
      %22 = arith.mulf %19, %21 : vector<16x1xf32>
      %23 = vector.broadcast %18 : vector<16x1xf32> to vector<16x128xf32>
      %24 = arith.subf %14, %23 : vector<16x128xf32>
      %25 = math.exp %24 : vector<16x128xf32>
      %cst_14 = arith.constant dense<0.000000e+00> : vector<16xf32>
      %26 = vector.multi_reduction <add>, %25, %cst_14 [1] : vector<16x128xf32> to vector<16xf32>
      %27 = vector.shape_cast %26 : vector<16xf32> to vector<16x1xf32>
      %28 = arith.addf %22, %27 : vector<16x1xf32>
      %c0_15 = arith.constant 0 : index
      %c0_16 = arith.constant 0 : index
      %29 = vector.load %arg7[%c0_15, %c0_16] : memref<16x1xf32, #tpu.memory_space<vmem>>, vector<16x1xf32>
      tpu.vector_store %arg7[%c0_15, %c0_16], %28 {strides = array<i32>} : memref<16x1xf32, #tpu.memory_space<vmem>>, vector<16x1xf32>,
      %c0_17 = arith.constant 0 : index
      %c0_18 = arith.constant 0 : index
      %30 = vector.load %arg6[%c0_17, %c0_18] : memref<16x1xf32, #tpu.memory_space<vmem>>, vector<16x1xf32>
      tpu.vector_store %arg6[%c0_17, %c0_18], %18 {strides = array<i32>} : memref<16x1xf32, #tpu.memory_space<vmem>>, vector<16x1xf32>,
      %c128_i32 = arith.constant 128 : i32
      %31 = arith.muli %arg1, %c128_i32 : i32
      %32 = tpu.assume_multiple %31, 128 : i32
      %c0_19 = arith.constant 0 : index
      %33 = arith.index_cast %32 : i32 to index
      %34 = vector.load %arg8[%c0_19, %33] : memref<16x128xf32, #tpu.memory_space<vmem>>, vector<16x128xf32>
      tpu.vector_store %arg8[%c0_19, %33], %14 {strides = array<i32>} : memref<16x128xf32, #tpu.memory_space<vmem>>, vector<16x128xf32>,
    } else {
    }
    %c1_i32_2 = arith.constant 1 : i32
    %6 = arith.cmpi sge, %arg1, %c1_i32_2 : i32
    %7 = arith.extui %6 : i1 to i32
    %c0_i32_3 = arith.constant 0 : i32
    %8 = arith.cmpi ne, %7, %c0_i32_3 : i32
    scf.if %8 {
      %c0 = arith.constant 0 : index
      %c0_4 = arith.constant 0 : index
      %9 = vector.load %arg6[%c0, %c0_4] : memref<16x1xf32, #tpu.memory_space<vmem>>, vector<16x1xf32>
      %c0_5 = arith.constant 0 : index
      %c0_6 = arith.constant 0 : index
      %10 = vector.load %arg7[%c0_5, %c0_6] : memref<16x1xf32, #tpu.memory_space<vmem>>, vector<16x1xf32>
      %11 = math.log %10 : vector<16x1xf32>
      %12 = arith.addf %9, %11 : vector<16x1xf32>
      %c1_i32_7 = arith.constant 1 : i32
      %13 = arith.subi %arg1, %c1_i32_7 : i32
      %c128_i32 = arith.constant 128 : i32
      %14 = arith.muli %13, %c128_i32 : i32
      %15 = tpu.assume_multiple %14, 128 : i32
      %c0_8 = arith.constant 0 : index
      %16 = arith.index_cast %15 : i32 to index
      %17 = vector.load %arg8[%c0_8, %16] : memref<16x128xf32, #tpu.memory_space<vmem>>, vector<16x128xf32>
      %18 = vector.broadcast %12 : vector<16x1xf32> to vector<16x128xf32>
      %19 = arith.subf %17, %18 : vector<16x128xf32>
      %c0_9 = arith.constant 0 : index
      %c0_10 = arith.constant 0 : index
      %20 = vector.load %arg5[%c0_9, %c0_10] : memref<16x128xf32, #tpu.memory_space<vmem>>, vector<16x128xf32>
      tpu.vector_store %arg5[%c0_9, %c0_10], %19 {strides = array<i32>} : memref<16x128xf32, #tpu.memory_space<vmem>>, vector<16x128xf32>,
    } else {
    }
    return
  }
  func.func @transform_0(%arg0: i32, %arg1: i32) -> (i32, i32) {
    %c0_i32 = arith.constant 0 : i32
    %c0_i32_0 = arith.constant 0 : i32
    return %arg0, %c0_i32 : i32, i32
  }
  func.func @transform_1(%arg0: i32, %arg1: i32) -> (i32, i32) {
    %c1_i32 = arith.constant 1 : i32
    %0 = arith.cmpi slt, %arg1, %c1_i32 : i32
    %c0_i32 = arith.constant 0 : i32
    %1 = arith.select %0, %arg1, %c0_i32 : i32
    %c0_i32_0 = arith.constant 0 : i32
    %c0_i32_1 = arith.constant 0 : i32
    return %c0_i32_0, %1 : i32, i32
  }
  func.func @transform_2(%arg0: i32, %arg1: i32) -> (i32, i32) {
    %c1_i32 = arith.constant 1 : i32
    %0 = arith.cmpi slt, %arg1, %c1_i32 : i32
    %c0_i32 = arith.constant 0 : i32
    %1 = arith.select %0, %arg1, %c0_i32 : i32
    %c0_i32_0 = arith.constant 0 : i32
    %c0_i32_1 = arith.constant 0 : i32
    return %c0_i32_0, %1 : i32, i32
  }
  func.func @transform_3(%arg0: i32, %arg1: i32) -> (i32, i32) {
    %c1_i32 = arith.constant 1 : i32
    %0 = arith.subi %arg1, %c1_i32 : i32
    %c0_i32 = arith.constant 0 : i32
    %1 = arith.maxsi %0, %c0_i32 : i32
    %c0_i32_0 = arith.constant 0 : i32
    return %arg0, %1 : i32, i32
  }
}

</mosaic_0001>

<bundles_post_ra>
// kernel: tpu_custom_call.1
= control target key start
LH: loop header
LB: loop body
LE: loop exit
PB: predicated region body
PF: predicated region fallthrough
CT: control target
= control target key end

     0   :  { %s1092_s0 = inlined_call_operand.hbm [shape: bf16[16,32], index: 0, kind: input, shape index: {}]   ;;  %s1093_s1 = inlined_call_operand.hbm [shape: bf16[32,128], index: 1, kind: input, shape index: {}]   ;;  %s1094_s2 = inlined_call_operand.vmem [shape: f32[1,128], index: 2, kind: input, shape index: {}]   ;;  %s1095_s3 = inlined_call_operand.hbm [shape: f32[16,128], index: 3, kind: output, shape index: {}]  }
   0x1   :  { %1099 = sst [smem:[#allocation15_spill]] %s1092_s0 }
   0x2   :  { %8 = vsyncpa [#allocation6], 0 }
   0x3   :  { %9 = vsyncpa [#allocation9], 0 }
   0x4   :  { %11 = vsyncpa [#allocation9 + $0x1], 0 }
   0x5   :  { %12 = vsyncpa [#allocation7], 0 }
   0x6   :  { %14 = vsyncpa [#allocation7 + $0x1], 0  ;;  %s908_s12 = smov 0   ;;  %s910_s13 = smov 0  }
   0x7   :  { %s912_s14 = smov 0   ;;  %s914_s15 = smov 0  }
   0x8   :  { %s916_s16 = smov 0   ;;  %s918_s17 = smov 0  }
   0x9   :  { %s920_s18 = smov 0   ;;  %s922_s19 = smov 0  }
   0xa LB: > { %s549_s20 = sadd.s32 4294967295, %s877_s19   ;;  %s550_s21 = sadd.s32 4294967294, %s877_s19   ;;  %s877_s19 = sphi %s922_s19, %s20_s19   ;;  %s873_s18 = sphi %s920_s18, %s1117_s18   ;;  %s869_s17 = sphi %s918_s17, %s1116_s17   ;;  %s865_s16 = sphi %s916_s16, %s1115_s16   ;;  %s861_s15 = sphi %s914_s15, %s1114_s15   ;;  %s857_s14 = sphi %s912_s14, %s1113_s14   ;;  %s853_s13 = sphi %s910_s13, %s1073_s13   ;;  %s849_s12 = sphi %s908_s12, %s1112_s12  }
   0xb   : > { %p82_p0 = scmp.ne.s32.totalorder %s861_s15, %s857_s14  ;;  %p949_p1 = scmp.eq.s32.totalorder %s549_s20, 0 }
   0xc   : > { %p846_p2 = scmp.ne.s32.totalorder %s853_s13, 0  ;;  %p144_p4 = scmp.eq.s32.totalorder %s549_s20, 1 }
   0xd   : > { %p956_p3 = por %p949_p1, %p82_p0  ;;  %p149_p5 = scmp.ne.s32.totalorder %s853_s13, %s849_s12 }
   0xe   : > { %p150_p6 = scmp.eq.s32.totalorder %s550_s21, 1  ;;  %p962_p7 = por %p846_p2, %p144_p4 }
   0xf   : > { %p553_p8 = scmp.ge.s32.totalorder %s877_s19, 1  ;;  %p157_p10 = scmp.lt.s32.totalorder %s877_s19, 3 }
  0x10   : > { %p967_p9 = por %p150_p6, %p149_p5  ;;  %s1104_s0 = sld [smem:[#allocation15_spill]] }
  0x11   : > { %p975_p11 = pnand %p553_p8, %p157_p10  ;;  %s879_s30 = smov [#allocation5]  }
  0x12   : > { %s173_s4 = sshll.u32 %s879_s30, 4  ;;  %s1096_s5 = smov 64   ;;  %s174_s4 = int_to_ptr.vmem [resolvable:$true] %s173_s4 }
  0x13   : > { %p597_p12 = pneg %p975_p11  ;;  %s1097_s6 = smov 4  }
  0x14   : > { %s29_s7 = sadd.s32 1, %s873_s18  ;;  %p62_p4 = scmp.lt.s32.totalorder %s873_s18, 1 }
  0x15   : > { %p598_p13 = pnand %p597_p12, %p949_p1  ;;  %p30_p2 = scmp.ge.s32.totalorder %s29_s7, 2 }
  0x16   : > { %s171_s28 = sshll.u32 %s1104_s0, 4  ;;  %p76_p5 = scmp.ne.s32.totalorder %s865_s16, %s861_s15  ;;  %s172_s28 = int_to_ptr.hbm [resolvable:$true] %s171_s28 }
  0x17   : > { %600 = dma.hbm_to_vmem [thread:$0]  (!%p598_p13), %s172_s28, 128, %s174_s4, [#allocation6], %s1096_s5, %s1096_s5, %s1097_s6  }
  0x18   : > { %s1119_s7 = smov (%p30_p2, %s29_s7), 0  ;;  %p77_p8 = scmp.eq.s32.totalorder %s877_s19, 0 }
  0x19   : > { %1106 = sst [smem:[#allocation14_spill]] %s1119_s7  ;;  %p64_p6 = scmp.lt.s32.totalorder %s1119_s7, 1 }
  0x1a   : > { %s63_s8 = scalar_select %p62_p4, %s873_s18, 0 }
  0x1b   : > { %s65_s9 = scalar_select %p64_p6, %s1119_s7, 0 }
  0x1c   : > { %s69_s10 = sadd.s32 1, %s865_s16  ;;  %p78_p12 = por %p77_p8, %p76_p5 }
  0x1d   : > { %s66_s11 = ssub.s32 %s63_s8, %s65_s9  ;;  %s187_s20 = sand.u32 1, %s865_s16  }
  0x1e   : > { %p67_p10 = scmp.eq.s32.totalorder %s66_s11, 0  ;;  %s557_s21 = sshll.u32 %s63_s8, 2 }
  0x1f   : > { %p610_p13 = scmp.lt.s32.totalorder %s877_s19, 2  ;;  %s556_s26 = sshll.u32 %s187_s20, 4 }
  0x20   : > { %s999_s14 = scalar_select %p67_p10, %s865_s16, %s69_s10  }
  0x21   : > { %s197_s30 = scalar_lea.hbm %s1093_s1, %s557_s21  ;;  %s191_s5 = scalar_lea.vmem [#allocation8], %s556_s26 }
  0x22   : > { %s198_s4 = sshll.u32 %s197_s30, 4  ;;  %s200_s6 = sshll.u32 %s191_s5, 4  ;;  %s199_s4 = int_to_ptr.hbm [resolvable:$true] %s198_s4  ;;  %s201_s6 = int_to_ptr.vmem [resolvable:$true] %s200_s6 }
  0x23   : > { %p602_p2 = pnand %p610_p13, %p78_p12  ;;  %s188_s0 = scalar_lea.sflag [#allocation9], %s187_s20 }
  0x24   : > { %s740_s9 = sshra.s32 %s199_s4, 4  ;;  %s747_s7 = scalar_lea.hbm %s1093_s1, 16  ;;  %s741_s9 = int_to_ptr.hbm [resolvable:$true] %s740_s9 }
  0x25   : > { %s742_s11 = scalar_lea.hbm %s741_s9, 16  ;;  %p744_p5 = pneg %p602_p2 }
  0x26   : > { %p743_p4 = scmp.ne.s32.totalorder %s741_s9, %s742_s11  ;;  %p749_p10 = scmp.lt.s32.totalorder %s747_s7, %s742_s11 }
  0x28   : > { %p745_p6 = pnand %p744_p5, %p743_p4 }
  0x2a   : > { %p746_p8 = pneg %p745_p6 }
  0x2c   : > { %p751_p0 = pnand %p749_p10, %p746_p8 }
  0x2e   : > { %754 = shalt.err (!%p751_p0)
}
  0x2f   : > { %s1107_s21 = smov 4   ;;  %s1108_s5 = smov 64  }
  0x30   : > { %604 = dma.hbm_to_vmem [thread:$0]  (!%p602_p2), %s199_s4, 256, %s201_s6, %s188_s0, %s1108_s5, %s1108_s5, %s1107_s21  }
  0x31   : > { %222 = sbr.rel (%p975_p11) target bundleno = 749 (0x2ed), region = 32 }
  0x36   : > { %835 = dma.done.wait (%p949_p1), [#allocation6], 128  }
  0x37   : > { %837 = vsyncadd (%p949_p1), [#allocation6], 4294967168  ;;  %s229_s20 = sand.u32 1, %s861_s15  }
  0x38   : > { %s560_s26 = sshll.u32 %s229_s20, 4  ;;  %s230_s7 = scalar_lea.sflag [#allocation9], %s229_s20 }
  0x39   : > { %s233_s27 = scalar_lea.vmem [#allocation8], %s560_s26 }
  0x3a   : > { %839 = dma.done.wait (%p956_p3), %s230_s7, 256  }
  0x3b   : > { %841 = vsyncadd (%p956_p3), %s230_s7, 4294967040  ;;  %s259_s0 = sand.u32 1, %s853_s13   ;;  %p265_p11 = scmp.lt.s32.totalorder %s869_s17, 1 }
  0x3c   : > { %s561_s22 = sshll.u32 %s259_s0, 4  ;;  %p562_p3 = scmp.ne.s32.totalorder %s869_s17, 0 }
  0x3d   : > { %s266_s29 = scalar_select %p265_p11, %s869_s17, 0 }
  0x3e   : > { %s1033_s4 = scalar_lea.vmem [#allocation10], %s561_s22  ;;  %280 = sbr.rel (%p562_p3) target bundleno = 72 (0x48), region = 44 }
  0x3f   : > { %p267_p1 = scmp.lt.s32.totalorder %s266_s29, 0 }
  0x41   : > { %s1121_s29 = smov (!%p267_p1, %s266_s29), 0 }
  0x42   : > { %s269_s30 = scalar_lea.vmem %s1094_s2, %s1121_s29 }
  0x43   : > { %vm281_vm0 = vcmask 7168   ;;  %v882_v0 = vmov -1e+30   ;;  %v883_v1 = vmov 0.0  }
  0x44   : > { %282 = vst.msk [vmem:[#allocation2] sm:$0xff] %vm281_vm0, %v882_v0 }
  0x45   : > { %283 = vst.msk [vmem:[#allocation2 + $0x8] sm:$0xff] %vm281_vm0, %v882_v0 }
  0x46   : > { %284 = vst.msk [vmem:[#allocation3] sm:$0xff] %vm281_vm0, %v883_v1 }
  0x47   : > { %285 = vst.msk [vmem:[#allocation3 + $0x8] sm:$0xff] %vm281_vm0, %v883_v1 }
  0x48 PF: > { %p563_p0 = scmp.ge.s32.totalorder %s869_s17, 1 }
  0x49   : > { %s577_s23 = sshll.u32 (!%p563_p0), %s869_s17, 7 }
  0x4a   : > { %289 = sbr.rel (%p563_p0) target bundleno = 586 (0x24a), region = 48  ;;  %s381_s9 = sshra.s32 (!%p563_p0), %s577_s23, 7 }
  0x4b   : > { %s383_s11 = scalar_lea.vmem (!%p563_p0), [#allocation4], %s381_s9 }
  0x4f   : > { %v588_v2 = vld [vmem:[%s233_s27 + $0x8] sm:$0xff]  ;;  %v587_v3 = vld [vmem:[%s233_s27] sm:$0xff]  ;;  %vm317_vm1 = vcmask 261120   ;;  %v884_v10 = vmov 0   ;;  %vm375_vm2 = vcmask 7168  }
  0x50   : > { %327 = vmatpush.bf16.msra.mxu0 %v588_v2  ;;  %v586_v4 = vld [vmem:[#allocation5] sm:$0xff]  ;;  %v696_v5 = vld [vmem:[%s269_s30] ss:$0 sm:$0xff]  ;;  %694 = vset.pattern.permute.xlu1 %v884_v10  ;;  %v336_v15 = vld [vmem:[#allocation2 + $0x8] sm:$0xff] }
  0x51   : > { %695 = vset.pattern.permute.xlu0 %v884_v10  ;;  %v335_v11 = vld [vmem:[#allocation2] sm:$0xff]  ;;  %v343_v30 = vld [vmem:[#allocation3] sm:$0xff]  ;;  %v344_v35 = vld [vmem:[#allocation3 + $0x8] sm:$0xff] }
  0x54   : > { %328 = vmatpush.bf16.msra.mxu0 %v587_v3 }
  0x57   : > { %576 = vmatmul.msk.bf16.vlgmr.msra.gmra.mxu0 %vm317_vm1, %v586_v4 }
  0xd4   : > { %v330_v6 = vpop.f32.mrf.mxu0 }
  0xd5   : > { %v331_v7 = vadd.f32 %v696_v5, %v330_v6 }
  0xd7   : > { %384 = vst [vmem:[%s383_s11] sm:$0xff] %v331_v7  ;;  %337 = vmax.xlane.f32.xlu0 %v331_v7 }
  0xdc   : > { %v332_v8 = vpop.f32.mrf.mxu0 }
  0xdd   : > { %v333_v9 = vadd.f32 %v696_v5, %v332_v8 }
  0xdf   : > { %385 = vst [vmem:[%s383_s11 + $0x8] sm:$0xff] %v333_v9  ;;  %339 = vmax.xlane.f32.xlu0 %v333_v9 }
 0x14a   : > { %v338_v12 = vpop.xlane.xlu0 %337 }
 0x14b   : > { %v341_v13 = vmax.f32 %v335_v11, %v338_v12 }
 0x14d   : > { %v345_v14 = vsub.f32 %v335_v11, %v341_v13  ;;  %378 = vst.msk [vmem:[#allocation2] sm:$0xff] %vm375_vm2, %v341_v13  ;;  %355 = vperm.xlu1 %694, %v341_v13  }
 0x14f   : > { %v347_v27 = vmul.f32 1.442695, %v345_v14 }
 0x152   : > { %v340_v16 = vpop.xlane.xlu0 %339 }
 0x153   : > { %v342_v17 = vmax.f32 %v336_v15, %v340_v16 }
 0x155   : > { %v346_v18 = vsub.f32 %v336_v15, %v342_v17  ;;  %379 = vst.msk [vmem:[#allocation2 + $0x8] sm:$0xff] %vm375_vm2, %v342_v17  ;;  %360 = vperm.xlu1 %694, %v342_v17  }
 0x157   : > { %v349_v28 = vmul.f32 1.442695, %v346_v18 }
 0x1bf   : > { %v356_v19 = vpop.permute.xlu1 %355 }
 0x1c0   : > { %v363_v20 = vsub.f32 %v331_v7, %v356_v19 }
 0x1c2   : > { %v365_v21 = vmul.f32 1.442695, %v363_v20 }
 0x1c4   : > { %697 = vpow2.f32 %v365_v21 }
 0x1c7   : > { %v361_v22 = vpop.permute.xlu1 %360 }
 0x1c8   : > { %v364_v23 = vsub.f32 %v333_v9, %v361_v22 }
 0x1ca   : > { %v698_v24 = vpop.eup %697  ;;  %v367_v25 = vmul.f32 1.442695, %v364_v23 }
 0x1cb   : > { %369 = vadd.xlane.f32.xlu2 %v698_v24 }
 0x1cc   : > { %699 = vpow2.f32 %v367_v25 }
 0x1cd   : > { %701 = vpow2.f32 %v347_v27 }
 0x1ce   : > { %703 = vpow2.f32 %v349_v28 }
 0x1d2   : > { %v700_v26 = vpop.eup %699 }
 0x1d3   : > { %371 = vadd.xlane.f32.xlu2 %v700_v26  ;;  %v702_v29 = vpop.eup %701 }
 0x1d4   : > { %v351_v31 = vmul.f32 %v702_v29, %v343_v30  ;;  %v704_v34 = vpop.eup %703 }
 0x1d5   : > { %v352_v36 = vmul.f32 %v704_v34, %v344_v35 }
 0x23e   : > { %v370_v32 = vpop.xlane.xlu2 %369 }
 0x23f   : > { %v373_v33 = vadd.f32 %v370_v32, %v351_v31 }
 0x241   : > { %376 = vst.msk [vmem:[#allocation3] sm:$0xff] %vm375_vm2, %v373_v33 }
 0x246   : > { %v372_v37 = vpop.xlane.xlu2 %371 }
 0x247   : > { %v374_v38 = vadd.f32 %v372_v37, %v352_v36 }
 0x249   : > { %377 = vst.msk [vmem:[#allocation3 + $0x8] sm:$0xff] %vm375_vm2, %v374_v38 }
 0x24a PF: > { %389 = sbr.rel (%p265_p11) target bundleno = 729 (0x2d9), region = 52  ;;  %s579_s8 = sadd.s32 (!%p265_p11), 4294967295, %s869_s17 }
 0x24b   : > { %s580_s10 = sshll.u32 (!%p265_p11), %s579_s8, 7 }
 0x24c   : > { %s402_s21 = sshra.s32 (!%p265_p11), %s580_s10, 7 }
 0x24d   : > { %s404_s5 = scalar_lea.vmem (!%p265_p11), [#allocation4], %s402_s21 }
 0x24f   : > { %v392_v39 = vld [vmem:[#allocation3] sm:$0xff]  ;;  %v885_v40 = vmov 0   ;;  %v390_v43 = vld [vmem:[#allocation2] sm:$0xff]  ;;  %v391_v48 = vld [vmem:[#allocation2 + $0x8] sm:$0xff] }
 0x250   : > { %705 = vset.pattern.permute.xlu0 %v885_v40  ;;  %706 = vlog2.f32 %v392_v39  ;;  %v393_v41 = vld [vmem:[#allocation3 + $0x8] sm:$0xff]  ;;  %v405_v50 = vld [vmem:[%s404_s5] sm:$0xff]  ;;  %v406_v53 = vld [vmem:[%s404_s5 + $0x8] sm:$0xff] }
 0x251   : > { %708 = vlog2.f32 %v393_v41 }
 0x256   : > { %v707_v42 = vpop.eup %706 }
 0x257   : > { %v395_v44 = vmul.f32 0.6931472, %v707_v42  ;;  %v709_v45 = vpop.eup %708 }
 0x258   : > { %v397_v47 = vmul.f32 0.6931472, %v709_v45 }
 0x259   : > { %v398_v46 = vadd.f32 %v395_v44, %v390_v43 }
 0x25a   : > { %v399_v49 = vadd.f32 %v397_v47, %v391_v48 }
 0x25b   : > { %409 = vperm.xlu0 %705, %v398_v46  }
 0x263   : > { %414 = vperm.xlu0 %705, %v399_v49  }
 0x2cd   : > { %v410_v51 = vpop.permute.xlu0 %409 }
 0x2ce   : > { %v417_v52 = vsub.f32 %v405_v50, %v410_v51 }
 0x2d0   : > { %419 = vst [vmem:[%s1033_s4] sm:$0xff] %v417_v52 }
 0x2d5   : > { %v415_v54 = vpop.permute.xlu0 %414 }
 0x2d6   : > { %v418_v55 = vsub.f32 %v406_v53, %v415_v54 }
 0x2d8   : > { %420 = vst [vmem:[%s1033_s4 + $0x8] sm:$0xff] %v418_v55 }
 0x2d9 PF: > { %s582_s20 = sadd.s32 4294967295, %s869_s17  ;;  %s438_s26 = sshll.u32 %s1033_s4, 4  ;;  %s439_s26 = int_to_ptr.vmem [resolvable:$true] %s438_s26 }
 0x2da   : > { %p430_p12 = scmp.gt.s32.totalorder %s582_s20, 0  ;;  %s422_s28 = scalar_lea.sflag [#allocation7], %s259_s0 }
 0x2db   : > { %s790_s9 = scalar_lea.hbm %s1095_s3, 16 }
 0x2dc   : > { %s1123_s20 = smov (!%p430_p12, %s582_s20), 0 }
 0x2dd   : > { %s583_s7 = sshll.u32 %s1123_s20, 3 }
 0x2de   : > { %s437_s29 = scalar_lea.hbm %s1095_s3, %s583_s7 }
 0x2df   : > { %s440_s6 = sshll.u32 %s437_s29, 4  ;;  %s441_s6 = int_to_ptr.hbm [resolvable:$true] %s440_s6 }
 0x2e0   : > { %s784_s30 = sshra.s32 %s441_s6, 4  ;;  %s785_s30 = int_to_ptr.hbm [resolvable:$true] %s784_s30 }
 0x2e1   : > { %s786_s23 = scalar_lea.hbm %s785_s30, 16  ;;  %p791_p5 = scmp.lt.s32.totalorder %s785_s30, %s1095_s3 }
 0x2e2   : > { %p787_p13 = scmp.ne.s32.totalorder %s785_s30, %s786_s23  ;;  %p792_p6 = scmp.lt.s32.totalorder %s790_s9, %s786_s23 }
 0x2e4   : > { %p788_p2 = pnand %p787_p13, %p962_p7  ;;  %p793_p8 = por %p792_p6, %p791_p5 }
 0x2e6   : > { %p789_p4 = pneg %p788_p2 }
 0x2e8   : > { %p794_p10 = pnand %p793_p8, %p789_p4 }
 0x2ea   : > { %797 = shalt.err (!%p794_p10)
}
 0x2eb   : > { %s886_s0 = smov 128   ;;  %s887_s10 = smov 8  }
 0x2ec   : > { %595 = dma.vmem_to_hbm [thread:$0]  (%p962_p7), %s439_s26, 256, %s441_s6, %s422_s28, %s886_s0, %s886_s0, %s887_s10  }
 0x2ed PF: > { %s455_s21 = sand.u32 1, %s849_s12   ;;  %p1109_p11 = scmp.ge.s32.totalorder %s877_s19, 2 }
 0x2ee   : > { %s456_s5 = scalar_lea.sflag [#allocation7], %s455_s21 }
 0x2ef   : > { %p606_p1 = pnand %p1109_p11, %p967_p9 }
 0x2f1   : > { %p607_p3 = pneg %p606_p1 }
 0x2f3   : > { %843 = dma.done.wait (%p607_p3), %s456_s5, 256  }
 0x2f4   : > { %845 = vsyncadd (%p607_p3), %s456_s5, 4294967040  ;;  %s20_s19 = sadd.s32 1, %s877_s19   ;;  %s1110_s24 = smov %s999_s14 }
 0x2f5   : > { %p17_p0 = scmp.ge.s32.totalorder %s20_s19, 4   ;;  %s1111_s20 = sld [smem:[#allocation14_spill]] }
 0x2f6   : > { %s1112_s12 = smov %s853_s13  ;;  %s1073_s13 = smov 0  }
 0x2f7   : > { %s1113_s14 = smov %s861_s15  ;;  %s1114_s15 = smov %s865_s16 }
 0x2f8   : > { %s1115_s16 = smov %s1110_s24  ;;  %s1116_s17 = smov %s873_s18 }
 0x2f9   :  { %19 = sbr.rel (!%p17_p0) target bundleno = 10 (0xa), region = 100 }
 0x2fb   : > { %s1117_s18 = smov %s1111_s20 }
 0x2fe   :  { %462 = vsyncpa [#allocation6], 1 }
 0x2ff   :  { %464 = vsyncpa [#allocation6 + $0x1], 1 }
 0x300   :  { %465 = vsyncpa [#allocation9], 1 }
 0x301   :  { %467 = vsyncpa [#allocation9 + $0x1], 1 }
 0x302   :  { %468 = vsyncpa [#allocation7], 1 }
 0x303   :  { %470 = vsyncpa [#allocation7 + $0x1], 1 }

</bundles_post_ra>
